<compile_context>
chip_gen: v7x
topology: tpu7x:2x2x1
jax: 0.10.0
libtpu: 0.0.40
codegen_flags: <defaults>
</compile_context>

<pallas_src>
import jax
import jax.numpy as jnp
from jax.experimental import pallas as pl
from jax.experimental.pallas import tpu as pltpu

CLASS_NUM = 3
HIDDEN_DIM = 32
INPUT_FEATURE_DIM = 4

MAX_TB = 4096  # batch tile size (rows per grid step)


def _round_up(n, m):
    return ((n + m - 1) // m) * m


def mlp_kernel(x_ref, w1_ref, b1_ref, w2_ref, b2_ref, o_ref):
    x = x_ref[...]                                   # (TB, 4)   f32
    w1 = w1_ref[...]                                 # (4, 32)   f32
    tb = x.shape[0]

    # fc1 on the VPU: 4 unrolled broadcast-FMA steps (K=4 is MXU-hostile).
    acc = jnp.broadcast_to(b1_ref[...], (tb, HIDDEN_DIM))       # (TB, 32)
    for j in range(INPUT_FEATURE_DIM):
        acc = acc + x[:, j:j + 1] * w1[j:j + 1, :]              # (TB,1)*(1,32)
    h = jnp.maximum(acc, 0.0)                                   # ReLU

    # fc2 on the MXU: real K=32 contraction, narrow N=3 output, f32 accumulate.
    o_ref[...] = (
        jnp.dot(h, w2_ref[...], preferred_element_type=jnp.float32)
        + b2_ref[...]
    )


def net_forward(x, w1, b1, w2, b2):
    """x: (B, 4) f32; w1: (4, 32); b1: (1, 32); w2: (32, 3); b2: (1, 3)."""
    B = x.shape[0]

    # Batch tile selection:
    #   * round batch up to a multiple of 8 (sublane constraint),
    #   * split into >= 2 grid steps when possible (v7x dual-TC sharding),
    #   * cap at MAX_TB to bound VMEM while amortizing per-step overhead.
    B8 = _round_up(max(B, 8), 8)
    if B8 <= 8:
        TB = B8
    else:
        TB = min(MAX_TB, _round_up(pl.cdiv(B8, 2), 8))
    B_pad = _round_up(B8, TB)

    xp = x if B_pad == B else (
        jnp.zeros((B_pad, INPUT_FEATURE_DIM), jnp.float32).at[:B, :].set(x)
    )

    out = pl.pallas_call(
        mlp_kernel,
        out_shape=jax.ShapeDtypeStruct((B_pad, CLASS_NUM), jnp.float32),
        grid=(B_pad // TB,),
        in_specs=[
            pl.BlockSpec((TB, INPUT_FEATURE_DIM), lambda i: (i, 0)),
            pl.BlockSpec((INPUT_FEATURE_DIM, HIDDEN_DIM), lambda i: (0, 0)),
            pl.BlockSpec((1, HIDDEN_DIM), lambda i: (0, 0)),
            pl.BlockSpec((HIDDEN_DIM, CLASS_NUM), lambda i: (0, 0)),
            pl.BlockSpec((1, CLASS_NUM), lambda i: (0, 0)),
        ],
        out_specs=pl.BlockSpec((TB, CLASS_NUM), lambda i: (i, 0)),
        compiler_params=pltpu.CompilerParams(
            dimension_semantics=("parallel",),
            vmem_limit_bytes=32 * 1024 * 1024,
        ),
    )(xp, w1, b1, w2, b2)

    return out[:B, :]


def init_params(key):
    # Deterministic synthetic init mimicking PyTorch Linear's uniform(-1/sqrt(fan_in), +)
    k1, k2, k3, k4 = jax.random.split(key, 4)
    bound1 = 1.0 / jnp.sqrt(INPUT_FEATURE_DIM)
    bound2 = 1.0 / jnp.sqrt(HIDDEN_DIM)
    w1 = jax.random.uniform(k1, (INPUT_FEATURE_DIM, HIDDEN_DIM), jnp.float32,
                            -bound1, bound1)
    b1 = jax.random.uniform(k2, (1, HIDDEN_DIM), jnp.float32, -bound1, bound1)
    w2 = jax.random.uniform(k3, (HIDDEN_DIM, CLASS_NUM), jnp.float32,
                            -bound2, bound2)
    b2 = jax.random.uniform(k4, (1, CLASS_NUM), jnp.float32, -bound2, bound2)
    return w1, b1, w2, b2


if __name__ == "__main__":
    key = jax.random.PRNGKey(0)
    kx, kp = jax.random.split(key)

    batch = 8
    x = jax.random.uniform(kx, (batch, INPUT_FEATURE_DIM), jnp.float32,
                           0.0, 8.0)  # iris-like feature ranges
    w1, b1, w2, b2 = init_params(kp)

    out = jax.jit(net_forward)(x, w1, b1, w2, b2)
    out = jax.block_until_ready(out)

    # Pure-JAX reference check (exact f32 semantics of the PyTorch forward).
    ref = jnp.maximum(x @ w1 + b1, 0.0) @ w2 + b2
    assert out.shape == (batch, CLASS_NUM)
    assert jnp.allclose(out, ref, atol=1e-5, rtol=1e-5)

    print("KERNEL_OK")
</pallas_src>

<mosaic_0001>
module attributes {stable_mosaic.version = 11 : i64} {
  func.func @mlp_kernel(%arg0: i32, %arg1: memref<8x4xf32, #tpu.memory_space<vmem>>, %arg2: memref<4x32xf32, #tpu.memory_space<vmem>>, %arg3: memref<1x32xf32, #tpu.memory_space<vmem>>, %arg4: memref<32x3xf32, #tpu.memory_space<vmem>>, %arg5: memref<1x3xf32, #tpu.memory_space<vmem>>, %arg6: memref<8x3xf32, #tpu.memory_space<vmem>>) attributes {dimension_semantics = [#tpu.dimension_semantics<parallel>], iteration_bounds = array<i64: 1>, scalar_prefetch = 0 : i64, scratch_operands = 0 : i64, tpu.core_type = #tpu.core_type<tc>, window_params = [{transform_indices = @transform_0, window_bounds = array<i64: 8, 4>}, {pipeline_mode = #tpu.pipeline_mode<synchronous>, transform_indices = @transform_1, window_bounds = array<i64: 4, 32>}, {pipeline_mode = #tpu.pipeline_mode<synchronous>, transform_indices = @transform_2, window_bounds = array<i64: 1, 32>}, {pipeline_mode = #tpu.pipeline_mode<synchronous>, transform_indices = @transform_3, window_bounds = array<i64: 32, 3>}, {pipeline_mode = #tpu.pipeline_mode<synchronous>, transform_indices = @transform_4, window_bounds = array<i64: 1, 3>}, {transform_indices = @transform_5, window_bounds = array<i64: 8, 3>}]} {
    %c0 = arith.constant 0 : index
    %c0_0 = arith.constant 0 : index
    %0 = vector.load %arg1[%c0, %c0_0] : memref<8x4xf32, #tpu.memory_space<vmem>>, vector<8x4xf32>
    %c0_1 = arith.constant 0 : index
    %c0_2 = arith.constant 0 : index
    %1 = vector.load %arg2[%c0_1, %c0_2] : memref<4x32xf32, #tpu.memory_space<vmem>>, vector<4x32xf32>
    %c0_3 = arith.constant 0 : index
    %c0_4 = arith.constant 0 : index
    %2 = vector.load %arg3[%c0_3, %c0_4] : memref<1x32xf32, #tpu.memory_space<vmem>>, vector<1x32xf32>
    %3 = vector.shape_cast %2 : vector<1x32xf32> to vector<1x32xf32>
    %4 = vector.broadcast %3 : vector<1x32xf32> to vector<8x32xf32>
    %5 = vector.extract_strided_slice %0 {offsets = [0, 0], sizes = [8, 1], strides = [1, 1]} : vector<8x4xf32> to vector<8x1xf32>
    %6 = vector.extract_strided_slice %1 {offsets = [0, 0], sizes = [1, 32], strides = [1, 1]} : vector<4x32xf32> to vector<1x32xf32>
    %7 = vector.broadcast %5 : vector<8x1xf32> to vector<8x32xf32>
    %8 = vector.broadcast %6 : vector<1x32xf32> to vector<8x32xf32>
    %9 = arith.mulf %7, %8 : vector<8x32xf32>
    %10 = arith.addf %4, %9 : vector<8x32xf32>
    %11 = vector.extract_strided_slice %0 {offsets = [0, 1], sizes = [8, 1], strides = [1, 1]} : vector<8x4xf32> to vector<8x1xf32>
    %12 = vector.extract_strided_slice %1 {offsets = [1, 0], sizes = [1, 32], strides = [1, 1]} : vector<4x32xf32> to vector<1x32xf32>
    %13 = vector.broadcast %11 : vector<8x1xf32> to vector<8x32xf32>
    %14 = vector.broadcast %12 : vector<1x32xf32> to vector<8x32xf32>
    %15 = arith.mulf %13, %14 : vector<8x32xf32>
    %16 = arith.addf %10, %15 : vector<8x32xf32>
    %17 = vector.extract_strided_slice %0 {offsets = [0, 2], sizes = [8, 1], strides = [1, 1]} : vector<8x4xf32> to vector<8x1xf32>
    %18 = vector.extract_strided_slice %1 {offsets = [2, 0], sizes = [1, 32], strides = [1, 1]} : vector<4x32xf32> to vector<1x32xf32>
    %19 = vector.broadcast %17 : vector<8x1xf32> to vector<8x32xf32>
    %20 = vector.broadcast %18 : vector<1x32xf32> to vector<8x32xf32>
    %21 = arith.mulf %19, %20 : vector<8x32xf32>
    %22 = arith.addf %16, %21 : vector<8x32xf32>
    %23 = vector.extract_strided_slice %0 {offsets = [0, 3], sizes = [8, 1], strides = [1, 1]} : vector<8x4xf32> to vector<8x1xf32>
    %24 = vector.extract_strided_slice %1 {offsets = [3, 0], sizes = [1, 32], strides = [1, 1]} : vector<4x32xf32> to vector<1x32xf32>
    %25 = vector.broadcast %23 : vector<8x1xf32> to vector<8x32xf32>
    %26 = vector.broadcast %24 : vector<1x32xf32> to vector<8x32xf32>
    %27 = arith.mulf %25, %26 : vector<8x32xf32>
    %28 = arith.addf %22, %27 : vector<8x32xf32>
    %cst = arith.constant 0.000000e+00 : f32
    %29 = vector.broadcast %cst : f32 to vector<8x32xf32>
    %30 = arith.maximumf %28, %29 : vector<8x32xf32>
    %c0_5 = arith.constant 0 : index
    %c0_6 = arith.constant 0 : index
    %31 = vector.load %arg4[%c0_5, %c0_6] : memref<32x3xf32, #tpu.memory_space<vmem>>, vector<32x3xf32>
    %cst_7 = arith.constant dense<0.000000e+00> : vector<8x3xf32>
    %32 = tpu.matmul %30, %31, %cst_7 {dimension_numbers = #tpu.dot_dimension_numbers<[1], [0], [0], [1], [0, 0, 1, 1], [], []>} : vector<8x32xf32>, vector<32x3xf32>, vector<8x3xf32> -> vector<8x3xf32>
    %c0_8 = arith.constant 0 : index
    %c0_9 = arith.constant 0 : index
    %33 = vector.load %arg5[%c0_8, %c0_9] : memref<1x3xf32, #tpu.memory_space<vmem>>, vector<1x3xf32>
    %34 = vector.broadcast %33 : vector<1x3xf32> to vector<8x3xf32>
    %35 = arith.addf %32, %34 : vector<8x3xf32>
    %c0_10 = arith.constant 0 : index
    %c0_11 = arith.constant 0 : index
    %36 = vector.load %arg6[%c0_10, %c0_11] : memref<8x3xf32, #tpu.memory_space<vmem>>, vector<8x3xf32>
    tpu.vector_store %arg6[%c0_10, %c0_11], %35 {strides = array<i32>} : memref<8x3xf32, #tpu.memory_space<vmem>>, vector<8x3xf32>,
    return
  }
  func.func @transform_0(%arg0: i32) -> (i32, i32) {
    %c0_i32 = arith.constant 0 : i32
    %c0_i32_0 = arith.constant 0 : i32
    return %arg0, %c0_i32 : i32, i32
  }
  func.func @transform_1(%arg0: i32) -> (i32, i32) {
    %c0_i32 = arith.constant 0 : i32
    %c0_i32_0 = arith.constant 0 : i32
    %c0_i32_1 = arith.constant 0 : i32
    return %c0_i32, %c0_i32_0 : i32, i32
  }
  func.func @transform_2(%arg0: i32) -> (i32, i32) {
    %c0_i32 = arith.constant 0 : i32
    %c0_i32_0 = arith.constant 0 : i32
    %c0_i32_1 = arith.constant 0 : i32
    return %c0_i32, %c0_i32_0 : i32, i32
  }
  func.func @transform_3(%arg0: i32) -> (i32, i32) {
    %c0_i32 = arith.constant 0 : i32
    %c0_i32_0 = arith.constant 0 : i32
    %c0_i32_1 = arith.constant 0 : i32
    return %c0_i32, %c0_i32_0 : i32, i32
  }
  func.func @transform_4(%arg0: i32) -> (i32, i32) {
    %c0_i32 = arith.constant 0 : i32
    %c0_i32_0 = arith.constant 0 : i32
    %c0_i32_1 = arith.constant 0 : i32
    return %c0_i32, %c0_i32_0 : i32, i32
  }
  func.func @transform_5(%arg0: i32) -> (i32, i32) {
    %c0_i32 = arith.constant 0 : i32
    %c0_i32_0 = arith.constant 0 : i32
    return %arg0, %c0_i32 : i32, i32
  }
}

</mosaic_0001>

<bundles_post_ra>
// kernel: net_forward.1
= control target key start
LH: loop header
LB: loop body
LE: loop exit
PB: predicated region body
PF: predicated region fallthrough
CT: control target
= control target key end

     0   :  { %v199_v0 = vmov 0   ;;  %v200_v2 = vmov 2   ;;  %v201_v3 = vmov 1   ;;  %v202_v4 = vmov 3   ;;  %s263_s0 = inlined_call_operand.vmem [shape: f32[8,4], index: 0, kind: input, shape index: {}]   ;;  %s264_s3 = inlined_call_operand.vmem [shape: f32[32,3], index: 3, kind: input, shape index: {}]   ;;  %s265_s1 = inlined_call_operand.vmem [shape: f32[4,32], index: 1, kind: input, shape index: {}]   ;;  %s266_s2 = inlined_call_operand.vmem [shape: f32[1,32], index: 2, kind: input, shape index: {}]   ;;  %s267_s4 = inlined_call_operand.vmem [shape: f32[1,3], index: 4, kind: input, shape index: {}]   ;;  %s268_s5 = inlined_call_operand.vmem [shape: f32[8,3], index: 5, kind: output, shape index: {}]  }
   0x1   :  { %194 = vset.pattern.permute.xlu0 %v199_v0  ;;  %v20_v1 = vld [vmem:[%s263_s0] sm:$0xff]  ;;  %196 = vset.pattern.permute.xlu1 %v200_v2  ;;  %v72_v6 = vld [vmem:[%s264_s3 + $0x8] sm:$0xff]  ;;  %v203_v8 = vmov 0.0|0.0   ;;  %v73_v9 = vld [vmem:[%s264_s3 + $0x10] sm:$0xff]  ;;  %vm204_vm0 = vmmov 0   ;;  %v205_v12 = vmov 0.0   ;;  %v34_v13 = vlaneseq }
   0x2   :  { %31 = vperm.xlu0 %194, %v20_v1   ;;  %51 = vperm.xlu1 %196, %v20_v1   ;;  %v71_v5 = vld [vmem:[%s264_s3] sm:$0xff]  ;;  %v74_v10 = vld [vmem:[%s264_s3 + $0x18] sm:$0xff]  ;;  %vm82_vm1 = vcmask 261120   ;;  %vm156_vm2 = vcmask 23552  }
   0x3   :  { %v182_v7 = vpack.c.bf16 %v72_v6, %v71_v5  ;;  %181 = vmatprep.subr.bf16.mxu0 %v203_v8  ;;  %v185_v11 = vpack.c.bf16 %v74_v10, %v73_v9  ;;  %178 = vmatprep.mubr.msk.f32.mxu0 %vm204_vm0, %v205_v12  ;;  %v35_v14 = vshrl.u32 %v34_v13, 7  ;;  %v21_v16 = vld [vmem:[%s265_s1] sm:$0xf] }
   0x4   :  { %v162_v25 = vld [vmem:[%s266_s2] ss:$0 sm:$0xff] }
   0x5   :  { %183 = vmatpush3.bf16.msra.mxu0 %v182_v7  ;;  %v36_v15 = vsub.s32 0, %v35_v14  ;;  %v46_v18 = vsub.s32 1, %v35_v14  ;;  %v56_v20 = vsub.s32 2, %v35_v14  ;;  %v66_v22 = vsub.s32 3, %v35_v14  ;;  %v163_v38 = vld [vmem:[%s267_s4] ss:$0 sm:$0xff] }
   0x6   :  { %195 = vset.pattern.permute.xlu0 %v201_v3  ;;  %197 = vset.pattern.permute.xlu1 %v202_v4 }
   0x7   :  { %41 = vperm.xlu0 %195, %v20_v1   ;;  %61 = vperm.xlu1 %197, %v20_v1   ;;  %v37_v17 = vrot.slane %v21_v16, %v36_v15  ;;  %v47_v24 = vrot.slane %v21_v16, %v46_v18  ;;  %v57_v26 = vrot.slane %v21_v16, %v56_v20 }
   0x8   :  { %184 = vmatprep.subr.bf16.mxu0 %v203_v8  ;;  %v67_v27 = vrot.slane %v21_v16, %v66_v22 }
   0x9   :  { %186 = vmatpush3.bf16.msra.mxu0 %v185_v11 }
   0xb   :  { %198 = vset.pattern.permute.xlu0 %v202_v4 }
  0x81   :  { %v32_v19 = vpop.permute.xlu0 %31  ;;  %v52_v21 = vpop.permute.xlu1 %51 }
  0x82   :  { %v38_v23 = vmul.f32 %v37_v17, %v32_v19  ;;  %v58_v32 = vmul.f32 %v57_v26, %v52_v21 }
  0x84   :  { %v39_v30 = vadd.f32 %v162_v25, %v38_v23 }
  0x86   :  { %v42_v28 = vpop.permute.xlu0 %41  ;;  %v62_v29 = vpop.permute.xlu1 %61 }
  0x87   :  { %v48_v31 = vmul.f32 %v47_v24, %v42_v28  ;;  %v68_v34 = vmul.f32 %v67_v27, %v62_v29 }
  0x89   :  { %v49_v33 = vadd.f32 %v48_v31, %v39_v30 }
  0x8b   :  { %v59_v35 = vadd.f32 %v58_v32, %v49_v33 }
  0x8d   :  { %v69_v36 = vadd.f32 %v68_v34, %v59_v35 }
  0x8f   :  { %v70_v37 = vmax.f32 %v69_v36, 0.0 }
  0x91   :  { %179 = vmatmul.mubr.msk.f32.vlgmr.msra.gmra.mrb[0].mxu0 %vm82_vm1, %v70_v37 }
 0x164   :  { %v152_v39 = vpop.f32.mrb[0].mxu0 }
 0x165   :  { %v153_v40 = vadd.f32 %v163_v38, %v152_v39  ;;  %v180_v41 = vpop.f32.mrb[1].mxu0 }
 0x167   :  { %157 = vst.msk [vmem:[%s268_s5] sm:$0xff] %vm156_vm2, %v153_v40 }

</bundles_post_ra>
